<compile_context>
chip_gen: v5e
topology: v5e:2x2
jax: 0.10.0
libtpu: 0.0.40
codegen_flags: <defaults>
</compile_context>

<pallas_src>
import functools

import jax
import jax.numpy as jnp
from jax.experimental import pallas as pl
from jax.experimental.pallas import tpu as pltpu

_EPS = 1e-15
_CHUNK = 256          # folded rows per in-kernel compute chunk (bounds intermediates)


def _cll_kernel(col_ref, tgt_ref, yp_ref, *rest, fold, chunk, has_weights):
    """out[i, j] = -log(clamp(yp[i, tgt[i, j]], eps, 1-eps)) * w[class]  (folded)."""
    if has_weights:
        w_ref, out_ref = rest
    else:
        (out_ref,) = rest
        w_ref = None

    tb, fc = yp_ref.shape
    n_chunks = tb // chunk                       # exact by construction

    # Hoisted broadcasts (JAX does not CSE broadcast_in_dim; do them once/step).
    col_b = jnp.broadcast_to(col_ref[...], (chunk, fc))                 # i32
    w_b = jnp.broadcast_to(w_ref[...], (chunk, fc)) if has_weights else None

    def compute(r0):
        yp = yp_ref[pl.ds(r0, chunk), :].astype(jnp.float32)  # per-tile upcast
        tg = tgt_ref[pl.ds(r0, chunk), :]                     # (chunk, fold) i32
        liks, wsels = [], []
        for j in range(fold):                                 # static unroll
            m = col_b == tg[:, j:j + 1]                       # bool mask, no convert
            liks.append(jnp.sum(jnp.where(m, yp, 0.0), axis=-1, keepdims=True))
            if has_weights:
                wsels.append(jnp.sum(jnp.where(m, w_b, 0.0), axis=-1, keepdims=True))
        lik = jnp.clip(jnp.concatenate(liks, axis=-1), _EPS, 1.0 - _EPS)
        nll = -jnp.log(lik)                                   # EUP slot (free-ish)
        if has_weights:
            nll = nll * jnp.concatenate(wsels, axis=-1)
        out_ref[pl.ds(r0, chunk), :] = nll

    if n_chunks == 1:
        compute(0)
    else:
        @pl.loop(0, n_chunks)
        def _(i):
            compute(pl.multiple_of(i * chunk, chunk))


def _choose_tiling(bf, fc, itemsize, block_rows=None):
    """Pick (block_rows, chunk_rows, vmem_limit_bytes) for the folded layout."""
    try:
        vmem_cap = int(pltpu.get_tpu_info().vmem_capacity_bytes)
    except Exception:
        vmem_cap = 0
    if vmem_cap >= 100 * 2**20:        # v5e / v6e class (128 MiB physical VMEM)
        vmem_limit = 64 * 2**20
    else:                              # v7x (64 MiB / TC) or unknown: scoped default
        vmem_limit = 32 * 2**20

    if bf <= _CHUNK:                   # single full-dim block, single chunk
        return bf, bf, vmem_limit

    if block_rows is not None:
        tb = int(block_rows)
    else:
        # Conservative per-folded-row VMEM cost: double-buffered y_pred tile plus
        # the (lane-padded to 128) y_true / out tiles.
        lane_pad = ((max(fc, 128) + 127) // 128) * 128
        per_row = 2 * (lane_pad * itemsize + 128 * 4 + 128 * 4)
        budget = vmem_limit - 12 * 2**20            # headroom: intermediates, misc
        tb = max(_CHUNK, budget // per_row)
    tb = max(_CHUNK, (tb // _CHUNK) * _CHUNK)
    tb = min(tb, max(_CHUNK, (bf // _CHUNK) * _CHUNK))
    return tb, _CHUNK, vmem_limit


class CumulativeLinkLoss:
    """JAX/Pallas port of the PyTorch CumulativeLinkLoss module."""

    def __init__(self, reduction: str = "elementwise_mean", class_weights=None,
                 block_rows=None):
        if reduction not in ("elementwise_mean", "sum", "none"):
            raise ValueError(f"{reduction} is not a valid reduction")
        self.reduction = reduction
        self.class_weights = (
            None if class_weights is None else jnp.asarray(class_weights, jnp.float32)
        )
        self.block_rows = block_rows     # optional folded-row tile override (tuning)

    def __call__(self, y_pred: jnp.ndarray, y_true: jnp.ndarray) -> jnp.ndarray:
        y_pred = jnp.asarray(y_pred)
        if not jnp.issubdtype(y_pred.dtype, jnp.floating):
            y_pred = y_pred.astype(jnp.float32)          # keep native float dtype otherwise
        B, C = y_pred.shape
        y_true = jnp.asarray(y_true, jnp.int32).reshape(B)

        # Lane folding: pack f rows into one folded row of width f*C (<= 128 lanes).
        fold = max(1, min(128 // C, 64)) if C < 128 else 1
        bf = -(-B // fold)
        Bp = bf * fold
        fc = fold * C

        if Bp != B:
            y_pred = jnp.pad(y_pred, ((0, Bp - B), (0, 0)))   # pad rows -> lik=eps, sliced off
            y_true = jnp.pad(y_true, (0, Bp - B))
        yp_folded = y_pred.reshape(bf, fc)
        tgt = (jnp.arange(Bp, dtype=jnp.int32) % fold) * C + y_true   # folded column index
        tgt = tgt.reshape(bf, fold)
        col_row = jnp.arange(fc, dtype=jnp.int32).reshape(1, fc)       # precomputed iota row

        itemsize = y_pred.dtype.itemsize
        tb, chunk, vmem_limit = _choose_tiling(bf, fc, itemsize, self.block_rows)
        grid = (pl.cdiv(bf, tb),)

        in_specs = [
            pl.BlockSpec((1, fc), lambda i: (0, 0)),     # iota row (resident)
            pl.BlockSpec((tb, fold), lambda i: (i, 0)),  # folded targets
            pl.BlockSpec((tb, fc), lambda i: (i, 0)),    # folded y_pred (lane-dense)
        ]
        args = [col_row, tgt, yp_folded]

        has_weights = self.class_weights is not None
        if has_weights:
            w_folded = jnp.tile(self.class_weights.reshape(1, C), (1, fold))  # (1, f*C)
            in_specs.append(pl.BlockSpec((1, fc), lambda i: (0, 0)))
            args.append(w_folded)

        kernel = functools.partial(_cll_kernel, fold=fold, chunk=chunk,
                                   has_weights=has_weights)

        cost = pl.CostEstimate(
            flops=3 * Bp * fc * (2 if has_weights else 1),
            transcendentals=Bp,
            bytes_accessed=(bf * fc * itemsize            # y_pred (native dtype)
                            + bf * fold * 4                # targets
                            + bf * fold * 4                # output
                            + (2 if has_weights else 1) * fc * 4),  # iota (+ weights)
        )

        nll_folded = pl.pallas_call(
            kernel,
            out_shape=jax.ShapeDtypeStruct((bf, fold), jnp.float32),
            grid=grid,
            in_specs=in_specs,
            out_specs=pl.BlockSpec((tb, fold), lambda i: (i, 0)),
            compiler_params=pltpu.CompilerParams(
                dimension_semantics=("parallel",),         # batch tiles independent
                vmem_limit_bytes=vmem_limit,
            ),
            cost_estimate=cost,
        )(*args)

        nll = nll_folded.reshape(Bp, 1)
        if Bp != B:
            nll = nll[:B]
        if self.reduction == "elementwise_mean":
            return jnp.mean(nll)
        if self.reduction == "sum":
            return jnp.sum(nll)
        return nll                                         # (B, 1), matches PyTorch 'none'


def _reference(y_pred, y_true, reduction, class_weights):
    eps = 1e-15
    y_pred = jnp.asarray(y_pred, jnp.float32)
    y_true = jnp.asarray(y_true, jnp.int32).reshape(-1)
    lik = jnp.clip(y_pred[jnp.arange(y_pred.shape[0]), y_true], eps, 1 - eps)
    nll = -jnp.log(lik)
    if class_weights is not None:
        nll = nll * jnp.asarray(class_weights, jnp.float32)[y_true]
    if reduction == "elementwise_mean":
        return jnp.mean(nll)
    if reduction == "sum":
        return jnp.sum(nll)
    return nll.reshape(-1, 1)


if __name__ == "__main__":
    key = jax.random.PRNGKey(0)
    k1, k2, k3, k4 = jax.random.split(key, 4)

    B, C = 8, 16
    y_pred = jax.nn.softmax(jax.random.normal(k1, (B, C), jnp.float32), axis=-1)
    y_true = jax.random.randint(k2, (B, 1), 0, C, jnp.int32)
    class_weights = jnp.linspace(0.5, 1.5, C, dtype=jnp.float32)

    # 1) weighted, mean reduction (single-block single-chunk path, fold=8)
    loss = jax.block_until_ready(
        CumulativeLinkLoss("elementwise_mean", class_weights)(y_pred, y_true))
    ref = _reference(y_pred, y_true, "elementwise_mean", class_weights)
    assert jnp.allclose(loss, ref, rtol=1e-5, atol=1e-6), (loss, ref)

    # 2) unweighted, sum reduction (no-weights specialization)
    loss_s = jax.block_until_ready(CumulativeLinkLoss("sum", None)(y_pred, y_true))
    ref_s = _reference(y_pred, y_true, "sum", None)
    assert jnp.allclose(loss_s, ref_s, rtol=1e-5, atol=1e-6), (loss_s, ref_s)

    # 3) 'none' reduction keeps the (B, 1) PyTorch shape
    loss_n = jax.block_until_ready(CumulativeLinkLoss("none", class_weights)(y_pred, y_true))
    ref_n = _reference(y_pred, y_true, "none", class_weights)
    assert loss_n.shape == (B, 1)
    assert jnp.allclose(loss_n, ref_n, rtol=1e-5, atol=1e-6)

    # 4) bf16 input path (no wrapper upcast; in-kernel f32 upcast before the log)
    y_pred_bf16 = y_pred.astype(jnp.bfloat16)
    loss_b = jax.block_until_ready(
        CumulativeLinkLoss("elementwise_mean", class_weights)(y_pred_bf16, y_true))
    ref_b = _reference(y_pred_bf16.astype(jnp.float32), y_true,
                       "elementwise_mean", class_weights)
    assert jnp.allclose(loss_b, ref_b, rtol=1e-5, atol=1e-6), (loss_b, ref_b)

    # 5) multi-block grid + partial last block + row padding (B % fold != 0) +
    #    in-kernel multi-chunk loop (block_rows=512 -> 2 chunks of 256)
    B2 = 16389
    y_pred2 = jax.nn.softmax(jax.random.normal(k3, (B2, C), jnp.float32), axis=-1)
    y_true2 = jax.random.randint(k4, (B2, 1), 0, C, jnp.int32)
    loss2 = jax.block_until_ready(
        CumulativeLinkLoss("elementwise_mean", class_weights, block_rows=512)(
            y_pred2, y_true2))
    ref2 = _reference(y_pred2, y_true2, "elementwise_mean", class_weights)
    assert jnp.allclose(loss2, ref2, rtol=1e-5, atol=1e-6), (loss2, ref2)

    print("KERNEL_OK")
</pallas_src>

<mosaic_0001>
module attributes {stable_mosaic.version = 11 : i64} {
  func.func @_cll_kernel(%arg0: i32, %arg1: memref<1x128xi32, #tpu.memory_space<vmem>>, %arg2: memref<1x8xi32, #tpu.memory_space<vmem>>, %arg3: memref<1x128xf32, #tpu.memory_space<vmem>>, %arg4: memref<1x128xf32, #tpu.memory_space<vmem>>, %arg5: memref<1x8xf32, #tpu.memory_space<vmem>>) attributes {dimension_semantics = [#tpu.dimension_semantics<parallel>], iteration_bounds = array<i64: 1>, scalar_prefetch = 0 : i64, scratch_operands = 0 : i64, tpu.core_type = #tpu.core_type<tc>, window_params = [{pipeline_mode = #tpu.pipeline_mode<synchronous>, transform_indices = @transform_0, window_bounds = array<i64: 1, 128>}, {transform_indices = @transform_1, window_bounds = array<i64: 1, 8>}, {transform_indices = @transform_2, window_bounds = array<i64: 1, 128>}, {pipeline_mode = #tpu.pipeline_mode<synchronous>, transform_indices = @transform_3, window_bounds = array<i64: 1, 128>}, {transform_indices = @transform_4, window_bounds = array<i64: 1, 8>}]} {
    %c0 = arith.constant 0 : index
    %c0_0 = arith.constant 0 : index
    %0 = vector.load %arg1[%c0, %c0_0] : memref<1x128xi32, #tpu.memory_space<vmem>>, vector<1x128xi32>
    %c0_1 = arith.constant 0 : index
    %c0_2 = arith.constant 0 : index
    %1 = vector.load %arg4[%c0_1, %c0_2] : memref<1x128xf32, #tpu.memory_space<vmem>>, vector<1x128xf32>
    %c0_3 = arith.constant 0 : index
    %c0_4 = arith.constant 0 : index
    %2 = vector.load %arg3[%c0_3, %c0_4] : memref<1x128xf32, #tpu.memory_space<vmem>>, vector<1x128xf32>
    %c0_5 = arith.constant 0 : index
    %c0_6 = arith.constant 0 : index
    %3 = vector.load %arg2[%c0_5, %c0_6] : memref<1x8xi32, #tpu.memory_space<vmem>>, vector<1x8xi32>
    %4 = vector.extract_strided_slice %3 {offsets = [0, 0], sizes = [1, 1], strides = [1, 1]} : vector<1x8xi32> to vector<1x1xi32>
    %5 = vector.broadcast %4 : vector<1x1xi32> to vector<1x128xi32>
    %6 = arith.cmpi eq, %0, %5 : vector<1x128xi32>
    %cst = arith.constant 0.000000e+00 : f32
    %7 = vector.broadcast %cst : f32 to vector<1x128xf32>
    %8 = arith.select %6, %2, %7 : vector<1x128xi1>, vector<1x128xf32>
    %cst_7 = arith.constant dense<0.000000e+00> : vector<1xf32>
    %9 = vector.multi_reduction <add>, %8, %cst_7 [1] : vector<1x128xf32> to vector<1xf32>
    %10 = vector.shape_cast %9 : vector<1xf32> to vector<1x1xf32>
    %cst_8 = arith.constant 0.000000e+00 : f32
    %11 = vector.broadcast %cst_8 : f32 to vector<1x128xf32>
    %12 = arith.select %6, %1, %11 : vector<1x128xi1>, vector<1x128xf32>
    %cst_9 = arith.constant dense<0.000000e+00> : vector<1xf32>
    %13 = vector.multi_reduction <add>, %12, %cst_9 [1] : vector<1x128xf32> to vector<1xf32>
    %14 = vector.shape_cast %13 : vector<1xf32> to vector<1x1xf32>
    %15 = vector.extract_strided_slice %3 {offsets = [0, 1], sizes = [1, 1], strides = [1, 1]} : vector<1x8xi32> to vector<1x1xi32>
    %16 = vector.broadcast %15 : vector<1x1xi32> to vector<1x128xi32>
    %17 = arith.cmpi eq, %0, %16 : vector<1x128xi32>
    %cst_10 = arith.constant 0.000000e+00 : f32
    %18 = vector.broadcast %cst_10 : f32 to vector<1x128xf32>
    %19 = arith.select %17, %2, %18 : vector<1x128xi1>, vector<1x128xf32>
    %cst_11 = arith.constant dense<0.000000e+00> : vector<1xf32>
    %20 = vector.multi_reduction <add>, %19, %cst_11 [1] : vector<1x128xf32> to vector<1xf32>
    %21 = vector.shape_cast %20 : vector<1xf32> to vector<1x1xf32>
    %cst_12 = arith.constant 0.000000e+00 : f32
    %22 = vector.broadcast %cst_12 : f32 to vector<1x128xf32>
    %23 = arith.select %17, %1, %22 : vector<1x128xi1>, vector<1x128xf32>
    %cst_13 = arith.constant dense<0.000000e+00> : vector<1xf32>
    %24 = vector.multi_reduction <add>, %23, %cst_13 [1] : vector<1x128xf32> to vector<1xf32>
    %25 = vector.shape_cast %24 : vector<1xf32> to vector<1x1xf32>
    %26 = vector.extract_strided_slice %3 {offsets = [0, 2], sizes = [1, 1], strides = [1, 1]} : vector<1x8xi32> to vector<1x1xi32>
    %27 = vector.broadcast %26 : vector<1x1xi32> to vector<1x128xi32>
    %28 = arith.cmpi eq, %0, %27 : vector<1x128xi32>
    %cst_14 = arith.constant 0.000000e+00 : f32
    %29 = vector.broadcast %cst_14 : f32 to vector<1x128xf32>
    %30 = arith.select %28, %2, %29 : vector<1x128xi1>, vector<1x128xf32>
    %cst_15 = arith.constant dense<0.000000e+00> : vector<1xf32>
    %31 = vector.multi_reduction <add>, %30, %cst_15 [1] : vector<1x128xf32> to vector<1xf32>
    %32 = vector.shape_cast %31 : vector<1xf32> to vector<1x1xf32>
    %cst_16 = arith.constant 0.000000e+00 : f32
    %33 = vector.broadcast %cst_16 : f32 to vector<1x128xf32>
    %34 = arith.select %28, %1, %33 : vector<1x128xi1>, vector<1x128xf32>
    %cst_17 = arith.constant dense<0.000000e+00> : vector<1xf32>
    %35 = vector.multi_reduction <add>, %34, %cst_17 [1] : vector<1x128xf32> to vector<1xf32>
    %36 = vector.shape_cast %35 : vector<1xf32> to vector<1x1xf32>
    %37 = vector.extract_strided_slice %3 {offsets = [0, 3], sizes = [1, 1], strides = [1, 1]} : vector<1x8xi32> to vector<1x1xi32>
    %38 = vector.broadcast %37 : vector<1x1xi32> to vector<1x128xi32>
    %39 = arith.cmpi eq, %0, %38 : vector<1x128xi32>
    %cst_18 = arith.constant 0.000000e+00 : f32
    %40 = vector.broadcast %cst_18 : f32 to vector<1x128xf32>
    %41 = arith.select %39, %2, %40 : vector<1x128xi1>, vector<1x128xf32>
    %cst_19 = arith.constant dense<0.000000e+00> : vector<1xf32>
    %42 = vector.multi_reduction <add>, %41, %cst_19 [1] : vector<1x128xf32> to vector<1xf32>
    %43 = vector.shape_cast %42 : vector<1xf32> to vector<1x1xf32>
    %cst_20 = arith.constant 0.000000e+00 : f32
    %44 = vector.broadcast %cst_20 : f32 to vector<1x128xf32>
    %45 = arith.select %39, %1, %44 : vector<1x128xi1>, vector<1x128xf32>
    %cst_21 = arith.constant dense<0.000000e+00> : vector<1xf32>
    %46 = vector.multi_reduction <add>, %45, %cst_21 [1] : vector<1x128xf32> to vector<1xf32>
    %47 = vector.shape_cast %46 : vector<1xf32> to vector<1x1xf32>
    %48 = vector.extract_strided_slice %3 {offsets = [0, 4], sizes = [1, 1], strides = [1, 1]} : vector<1x8xi32> to vector<1x1xi32>
    %49 = vector.broadcast %48 : vector<1x1xi32> to vector<1x128xi32>
    %50 = arith.cmpi eq, %0, %49 : vector<1x128xi32>
    %cst_22 = arith.constant 0.000000e+00 : f32
    %51 = vector.broadcast %cst_22 : f32 to vector<1x128xf32>
    %52 = arith.select %50, %2, %51 : vector<1x128xi1>, vector<1x128xf32>
    %cst_23 = arith.constant dense<0.000000e+00> : vector<1xf32>
    %53 = vector.multi_reduction <add>, %52, %cst_23 [1] : vector<1x128xf32> to vector<1xf32>
    %54 = vector.shape_cast %53 : vector<1xf32> to vector<1x1xf32>
    %cst_24 = arith.constant 0.000000e+00 : f32
    %55 = vector.broadcast %cst_24 : f32 to vector<1x128xf32>
    %56 = arith.select %50, %1, %55 : vector<1x128xi1>, vector<1x128xf32>
    %cst_25 = arith.constant dense<0.000000e+00> : vector<1xf32>
    %57 = vector.multi_reduction <add>, %56, %cst_25 [1] : vector<1x128xf32> to vector<1xf32>
    %58 = vector.shape_cast %57 : vector<1xf32> to vector<1x1xf32>
    %59 = vector.extract_strided_slice %3 {offsets = [0, 5], sizes = [1, 1], strides = [1, 1]} : vector<1x8xi32> to vector<1x1xi32>
    %60 = vector.broadcast %59 : vector<1x1xi32> to vector<1x128xi32>
    %61 = arith.cmpi eq, %0, %60 : vector<1x128xi32>
    %cst_26 = arith.constant 0.000000e+00 : f32
    %62 = vector.broadcast %cst_26 : f32 to vector<1x128xf32>
    %63 = arith.select %61, %2, %62 : vector<1x128xi1>, vector<1x128xf32>
    %cst_27 = arith.constant dense<0.000000e+00> : vector<1xf32>
    %64 = vector.multi_reduction <add>, %63, %cst_27 [1] : vector<1x128xf32> to vector<1xf32>
    %65 = vector.shape_cast %64 : vector<1xf32> to vector<1x1xf32>
    %cst_28 = arith.constant 0.000000e+00 : f32
    %66 = vector.broadcast %cst_28 : f32 to vector<1x128xf32>
    %67 = arith.select %61, %1, %66 : vector<1x128xi1>, vector<1x128xf32>
    %cst_29 = arith.constant dense<0.000000e+00> : vector<1xf32>
    %68 = vector.multi_reduction <add>, %67, %cst_29 [1] : vector<1x128xf32> to vector<1xf32>
    %69 = vector.shape_cast %68 : vector<1xf32> to vector<1x1xf32>
    %70 = vector.extract_strided_slice %3 {offsets = [0, 6], sizes = [1, 1], strides = [1, 1]} : vector<1x8xi32> to vector<1x1xi32>
    %71 = vector.broadcast %70 : vector<1x1xi32> to vector<1x128xi32>
    %72 = arith.cmpi eq, %0, %71 : vector<1x128xi32>
    %cst_30 = arith.constant 0.000000e+00 : f32
    %73 = vector.broadcast %cst_30 : f32 to vector<1x128xf32>
    %74 = arith.select %72, %2, %73 : vector<1x128xi1>, vector<1x128xf32>
    %cst_31 = arith.constant dense<0.000000e+00> : vector<1xf32>
    %75 = vector.multi_reduction <add>, %74, %cst_31 [1] : vector<1x128xf32> to vector<1xf32>
    %76 = vector.shape_cast %75 : vector<1xf32> to vector<1x1xf32>
    %cst_32 = arith.constant 0.000000e+00 : f32
    %77 = vector.broadcast %cst_32 : f32 to vector<1x128xf32>
    %78 = arith.select %72, %1, %77 : vector<1x128xi1>, vector<1x128xf32>
    %cst_33 = arith.constant dense<0.000000e+00> : vector<1xf32>
    %79 = vector.multi_reduction <add>, %78, %cst_33 [1] : vector<1x128xf32> to vector<1xf32>
    %80 = vector.shape_cast %79 : vector<1xf32> to vector<1x1xf32>
    %81 = vector.extract_strided_slice %3 {offsets = [0, 7], sizes = [1, 1], strides = [1, 1]} : vector<1x8xi32> to vector<1x1xi32>
    %82 = vector.broadcast %81 : vector<1x1xi32> to vector<1x128xi32>
    %83 = arith.cmpi eq, %0, %82 : vector<1x128xi32>
    %cst_34 = arith.constant 0.000000e+00 : f32
    %84 = vector.broadcast %cst_34 : f32 to vector<1x128xf32>
    %85 = arith.select %83, %2, %84 : vector<1x128xi1>, vector<1x128xf32>
    %cst_35 = arith.constant dense<0.000000e+00> : vector<1xf32>
    %86 = vector.multi_reduction <add>, %85, %cst_35 [1] : vector<1x128xf32> to vector<1xf32>
    %87 = vector.shape_cast %86 : vector<1xf32> to vector<1x1xf32>
    %cst_36 = arith.constant 0.000000e+00 : f32
    %88 = vector.broadcast %cst_36 : f32 to vector<1x128xf32>
    %89 = arith.select %83, %1, %88 : vector<1x128xi1>, vector<1x128xf32>
    %cst_37 = arith.constant dense<0.000000e+00> : vector<1xf32>
    %90 = vector.multi_reduction <add>, %89, %cst_37 [1] : vector<1x128xf32> to vector<1xf32>
    %91 = vector.shape_cast %90 : vector<1xf32> to vector<1x1xf32>
    %92 = tpu.concatenate %10, %21, %32, %43, %54, %65, %76, %87 in 1 : vector<1x1xf32>, vector<1x1xf32>, vector<1x1xf32>, vector<1x1xf32>, vector<1x1xf32>, vector<1x1xf32>, vector<1x1xf32>, vector<1x1xf32> -> vector<1x8xf32>
    %cst_38 = arith.constant 1.000000e-15 : f32
    %cst_39 = arith.constant 1.000000e+00 : f32
    %93 = vector.broadcast %cst_38 : f32 to vector<1x8xf32>
    %94 = arith.maximumf %93, %92 : vector<1x8xf32>
    %95 = vector.broadcast %cst_39 : f32 to vector<1x8xf32>
    %96 = arith.minimumf %95, %94 : vector<1x8xf32>
    %97 = math.log %96 : vector<1x8xf32>
    %cst_40 = arith.constant 0.000000e+00 : f32
    %98 = vector.broadcast %cst_40 : f32 to vector<1x8xf32>
    %99 = arith.subf %98, %97 : vector<1x8xf32>
    %100 = tpu.concatenate %14, %25, %36, %47, %58, %69, %80, %91 in 1 : vector<1x1xf32>, vector<1x1xf32>, vector<1x1xf32>, vector<1x1xf32>, vector<1x1xf32>, vector<1x1xf32>, vector<1x1xf32>, vector<1x1xf32> -> vector<1x8xf32>
    %101 = arith.mulf %99, %100 : vector<1x8xf32>
    %c0_41 = arith.constant 0 : index
    %c0_42 = arith.constant 0 : index
    %102 = vector.load %arg5[%c0_41, %c0_42] : memref<1x8xf32, #tpu.memory_space<vmem>>, vector<1x8xf32>
    tpu.vector_store %arg5[%c0_41, %c0_42], %101 {strides = array<i32>} : memref<1x8xf32, #tpu.memory_space<vmem>>, vector<1x8xf32>,
    return
  }
  func.func @transform_0(%arg0: i32) -> (i32, i32) {
    %c0_i32 = arith.constant 0 : i32
    %c0_i32_0 = arith.constant 0 : i32
    %c0_i32_1 = arith.constant 0 : i32
    return %c0_i32, %c0_i32_0 : i32, i32
  }
  func.func @transform_1(%arg0: i32) -> (i32, i32) {
    %c0_i32 = arith.constant 0 : i32
    %c0_i32_0 = arith.constant 0 : i32
    return %arg0, %c0_i32 : i32, i32
  }
  func.func @transform_2(%arg0: i32) -> (i32, i32) {
    %c0_i32 = arith.constant 0 : i32
    %c0_i32_0 = arith.constant 0 : i32
    return %arg0, %c0_i32 : i32, i32
  }
  func.func @transform_3(%arg0: i32) -> (i32, i32) {
    %c0_i32 = arith.constant 0 : i32
    %c0_i32_0 = arith.constant 0 : i32
    %c0_i32_1 = arith.constant 0 : i32
    return %c0_i32, %c0_i32_0 : i32, i32
  }
  func.func @transform_4(%arg0: i32) -> (i32, i32) {
    %c0_i32 = arith.constant 0 : i32
    %c0_i32_0 = arith.constant 0 : i32
    return %arg0, %c0_i32 : i32, i32
  }
}

</mosaic_0001>

<bundles_post_ra>
// kernel: tpu_custom_call.1
= control target key start
LH: loop header
LB: loop body
LE: loop exit
PB: predicated region body
PF: predicated region fallthrough
CT: control target
= control target key end

     0   :  { %9 = vsyncpa [#allocation3], 0  ;;  %s442_s0 = inlined_call_operand.hbm [shape: s32[1,128], index: 0, kind: input, shape index: {}]   ;;  %s443_s1 = inlined_call_operand.hbm [shape: s32[1,8], index: 1, kind: input, shape index: {}]   ;;  %s444_s2 = inlined_call_operand.vmem [shape: f32[1,128], index: 2, kind: input, shape index: {}]   ;;  %s445_s3 = inlined_call_operand.vmem [shape: f32[1,128], index: 3, kind: input, shape index: {}]   ;;  %s446_s4 = inlined_call_operand.hbm [shape: f32[1,8], index: 4, kind: output, shape index: {}]  }
   0x1   :  { %10 = vsyncpa [#allocation6], 0 }
   0x2   :  { %11 = vsyncpa [#allocation4], 0  ;;  %s17_s17 = sshll.u32 %s442_s0, 4  ;;  %s301_s18 = smov [#allocation2]   ;;  %s18_s17 = int_to_ptr.hbm [resolvable:$true] %s17_s17 }
   0x3   :  { %s19_s19 = sshll.u32 %s301_s18, 4  ;;  %s28_s22 = sshll.u32 %s443_s1, 4  ;;  %s20_s19 = int_to_ptr.vmem [resolvable:$true] %s19_s19  ;;  %s29_s22 = int_to_ptr.hbm [resolvable:$true] %s28_s22 }
   0x4   :  { %22 = dma.hbm_to_vmem [thread:$0]  %s18_s17, 16, %s20_s19, [#allocation3]  }
   0x5   :  { %s302_s23 = smov [#allocation5]  }
   0x6   :  { %s30_s24 = sshll.u32 %s302_s23, 4  ;;  %s31_s24 = int_to_ptr.vmem [resolvable:$true] %s30_s24 }
   0x7   :  { %33 = dma.hbm_to_vmem [thread:$0]  %s29_s22, 16, %s31_s24, [#allocation6]  }
   0x8   :  { %295 = dma.done.wait [#allocation3], 16  }
   0x9   :  { %296 = vsyncadd [#allocation3], 4294967280 }
   0xa   :  { %297 = dma.done.wait [#allocation6], 16  }
   0xb   :  { %298 = vsyncadd [#allocation6], 4294967280  ;;  %v303_v0 = vmov 1   ;;  %v304_v1 = vmov 0   ;;  %v305_v2 = vmov 2   ;;  %v306_v4 = vmov 3  }
   0xc   :  { %214 = vset.pattern.permute.xlu1 %v303_v0  ;;  %213 = vset.pattern.permute.xlu0 %v304_v1  ;;  %v49_v3 = vld [vmem:[#allocation5] sm:$0x1]  ;;  %v307_v5 = vmov 4   ;;  %v308_v6 = vmov 6   ;;  %v309_v7 = vmov 5   ;;  %v310_v8 = vmov 7  }
   0xd   :  { %215 = vset.pattern.permute.xlu2 %v305_v2  ;;  %65 = vperm.xlu1 %214, %v49_v3   ;;  %v46_v13 = vld [vmem:[#allocation2] sm:$0x1]  ;;  %vm56_vm0 = vcmask 1040384   ;;  %vm155_vm9 = vcmask 7168   ;;  %vm157_vm10 = vcmask 15360   ;;  %vm159_vm11 = vcmask 23552  }
   0xe   :  { %51 = vperm.xlu0 %213, %v49_v3   ;;  %78 = vperm.xlu2 %215, %v49_v3   ;;  %v346_v14 = vld [vmem:[%s444_s2] sm:$0x1]  ;;  %vm163_vm12 = vcmask 39936   ;;  %vm161_vm13 = vcmask 31744   ;;  %vm165_vm14 = vcmask 48128   ;;  %vm167_vm15 = vcmask 56320  }
   0xf   :  { %v351_v17 = vld [vmem:[%s445_s3] sm:$0x1]  ;;  %s311_s2 = smov [#allocation7]   ;;  %s191_s29 = sshll.u32 %s446_s4, 4  ;;  %s192_s29 = int_to_ptr.hbm [resolvable:$true] %s191_s29 }
  0x10   :  { %s189_s3 = sshll.u32 %s311_s2, 4  ;;  %s190_s3 = int_to_ptr.vmem [resolvable:$true] %s189_s3 }
  0x15   :  { %217 = vset.pattern.permute.xlu1 %v307_v5 }
  0x16   :  { %216 = vset.pattern.permute.xlu0 %v306_v4  ;;  %104 = vperm.xlu1 %217, %v49_v3  }
  0x17   :  { %91 = vperm.xlu0 %216, %v49_v3   ;;  %219 = vset.pattern.permute.xlu2 %v308_v6 }
  0x18   :  { %130 = vperm.xlu2 %219, %v49_v3  }
  0x1f   :  { %218 = vset.pattern.permute.xlu0 %v309_v7 }
  0x20   :  { %117 = vperm.xlu0 %218, %v49_v3  }
  0x28   :  { %220 = vset.pattern.permute.xlu0 %v310_v8 }
  0x29   :  { %143 = vperm.xlu0 %220, %v49_v3  }
  0x68   :  { %v79_v9 = vpop.permute.xlu2 %78 }
  0x69   :  { %v80_v18 = vperm.slane %v79_v9, 0 }
  0x6b   :  { %vm365_vm3 = vcmp.eq.s32.totalorder %v46_v13, %v80_v18 }
  0x6c   :  { %v82_v29 = vsel %vm365_vm3, %v346_v14, 0.0  ;;  %v86_v39 = vsel %vm365_vm3, %v351_v17, 0.0 }
  0x6d   :  { %v83_v34 = vsel %vm56_vm0, %v82_v29, 0.0  ;;  %v87_v43 = vsel %vm56_vm0, %v86_v39, 0.0 }
  0x72   :  { %v131_v10 = vpop.permute.xlu2 %130 }
  0x73   :  { %v132_v19 = vperm.slane %v131_v10, 0 }
  0x75   :  { %vm369_vm4 = vcmp.eq.s32.totalorder %v46_v13, %v132_v19 }
  0x76   :  { %v134_v31 = vsel %vm369_vm4, %v346_v14, 0.0  ;;  %v138_v63 = vsel %vm369_vm4, %v351_v17, 0.0 }
  0x77   :  { %v135_v35 = vsel %vm56_vm0, %v134_v31, 0.0  ;;  %v139_v0 = vsel %vm56_vm0, %v138_v63, 0.0 }
  0x7f   :  { %v66_v11 = vpop.permute.xlu1 %65 }
  0x80   :  { %v52_v12 = vpop.permute.xlu0 %51  ;;  %v67_v15 = vperm.slane %v66_v11, 0 }
  0x81   :  { %v53_v16 = vperm.slane %v52_v12, 0 }
  0x82   :  { %vm353_vm1 = vcmp.eq.s32.totalorder %v46_v13, %v67_v15 }
  0x83   :  { %vm54_vm2 = vcmp.eq.s32.totalorder %v46_v13, %v53_v16  ;;  %v69_v21 = vsel %vm353_vm1, %v346_v14, 0.0  ;;  %v73_v32 = vsel %vm353_vm1, %v351_v17, 0.0 }
  0x84   :  { %v60_v22 = vsel %vm54_vm2, %v351_v17, 0.0  ;;  %v55_v23 = vsel %vm54_vm2, %v346_v14, 0.0  ;;  %v70_v24 = vsel %vm56_vm0, %v69_v21, 0.0  ;;  %v74_v36 = vsel %vm56_vm0, %v73_v32, 0.0 }
  0x85   :  { %v61_v25 = vsel %vm56_vm0, %v60_v22, 0.0  ;;  %v57_v26 = vsel %vm56_vm0, %v55_v23, 0.0  ;;  %71 = vadd.xlane.f32.xlu2 %v70_v24 }
  0x86   :  { %62 = vadd.xlane.f32.xlu1 %v61_v25  ;;  %58 = vadd.xlane.f32.xlu0 %v57_v26 }
  0x88   :  { %v105_v38 = vpop.permute.xlu1 %104 }
  0x89   :  { %v92_v30 = vpop.permute.xlu0 %91  ;;  %v106_v41 = vperm.slane %v105_v38, 0 }
  0x8a   :  { %v93_v33 = vperm.slane %v92_v30, 0 }
  0x8b   :  { %vm397_vm6 = vcmp.eq.s32.totalorder %v46_v13, %v106_v41 }
  0x8c   :  { %vm385_vm5 = vcmp.eq.s32.totalorder %v46_v13, %v93_v33  ;;  %v112_v47 = vsel %vm397_vm6, %v351_v17, 0.0  ;;  %v108_v53 = vsel %vm397_vm6, %v346_v14, 0.0 }
  0x8d   :  { %75 = vadd.xlane.f32.xlu2 %v74_v36  ;;  %v95_v40 = vsel %vm385_vm5, %v346_v14, 0.0  ;;  %v99_v46 = vsel %vm385_vm5, %v351_v17, 0.0  ;;  %v113_v49 = vsel %vm56_vm0, %v112_v47, 0.0  ;;  %v109_v57 = vsel %vm56_vm0, %v108_v53, 0.0 }
  0x8e   :  { %84 = vadd.xlane.f32.xlu1 %v83_v34  ;;  %136 = vadd.xlane.f32.xlu0 %v135_v35  ;;  %v96_v44 = vsel %vm56_vm0, %v95_v40, 0.0  ;;  %v100_v48 = vsel %vm56_vm0, %v99_v46, 0.0 }
  0x92   :  { %v118_v42 = vpop.permute.xlu0 %117 }
  0x93   :  { %v119_v56 = vperm.slane %v118_v42, 0 }
  0x95   :  { %88 = vadd.xlane.f32.xlu2 %v87_v43  ;;  %vm120_vm8 = vcmp.eq.s32.totalorder %v46_v13, %v119_v56 }
  0x96   :  { %97 = vadd.xlane.f32.xlu1 %v96_v44  ;;  %v121_v59 = vsel %vm120_vm8, %v346_v14, 0.0  ;;  %v125_v60 = vsel %vm120_vm8, %v351_v17, 0.0 }
  0x97   :  { %v122_v61 = vsel %vm56_vm0, %v121_v59, 0.0  ;;  %v126_v62 = vsel %vm56_vm0, %v125_v60, 0.0 }
  0x9b   :  { %v144_v50 = vpop.permute.xlu0 %143 }
  0x9c   :  { %v145_v51 = vperm.slane %v144_v50, 0 }
  0x9d   :  { %101 = vadd.xlane.f32.xlu2 %v100_v48 }
  0x9e   :  { %114 = vadd.xlane.f32.xlu1 %v113_v49  ;;  %vm146_vm7 = vcmp.eq.s32.totalorder %v46_v13, %v145_v51 }
  0x9f   :  { %v151_v52 = vsel %vm146_vm7, %v351_v17, 0.0  ;;  %v147_v54 = vsel %vm146_vm7, %v346_v14, 0.0 }
  0xa0   :  { %v152_v55 = vsel %vm56_vm0, %v151_v52, 0.0  ;;  %v148_v58 = vsel %vm56_vm0, %v147_v54, 0.0  ;;  %vm182_vm0 = vcmask 57344  }
  0xa1   :  { %153 = vadd.xlane.f32.xlu0 %v152_v55 }
  0xa5   :  { %110 = vadd.xlane.f32.xlu2 %v109_v57 }
  0xa6   :  { %149 = vadd.xlane.f32.xlu1 %v148_v58 }
  0xad   :  { %123 = vadd.xlane.f32.xlu2 %v122_v61 }
  0xae   :  { %127 = vadd.xlane.f32.xlu1 %v126_v62 }
  0xb5   :  { %140 = vadd.xlane.f32.xlu2 %v139_v0 }
  0xf8   :  { %v72_v1 = vpop.xlane.xlu2 %71 }
  0xf9   :  { %v63_v2 = vpop.xlane.xlu1 %62  ;;  %v59_v10 = vpop.xlane.xlu0 %58 }
  0xfa   :  { %v156_v11 = vsel %vm155_vm9, %v59_v10, %v72_v1 }
 0x100   :  { %v76_v3 = vpop.xlane.xlu2 %75 }
 0x101   :  { %v85_v4 = vpop.xlane.xlu1 %84  ;;  %v137_v17 = vpop.xlane.xlu0 %136  ;;  %v174_v23 = vsel %vm155_vm9, %v63_v2, %v76_v3 }
 0x102   :  { %v158_v12 = vsel %vm157_vm10, %v156_v11, %v85_v4 }
 0x108   :  { %v89_v5 = vpop.xlane.xlu2 %88 }
 0x109   :  { %v98_v6 = vpop.xlane.xlu1 %97  ;;  %v175_v24 = vsel %vm157_vm10, %v174_v23, %v89_v5 }
 0x10a   :  { %v160_v13 = vsel %vm159_vm11, %v158_v12, %v98_v6 }
 0x110   :  { %v102_v7 = vpop.xlane.xlu2 %101 }
 0x111   :  { %v115_v8 = vpop.xlane.xlu1 %114  ;;  %v176_v25 = vsel %vm159_vm11, %v175_v24, %v102_v7 }
 0x112   :  { %v177_v28 = vsel %vm161_vm13, %v176_v25, %v115_v8 }
 0x114   :  { %v154_v33 = vpop.xlane.xlu0 %153 }
 0x118   :  { %v111_v9 = vpop.xlane.xlu2 %110 }
 0x119   :  { %v162_v14 = vsel %vm161_vm13, %v160_v13, %v111_v9  ;;  %v150_v16 = vpop.xlane.xlu1 %149 }
 0x120   :  { %v124_v15 = vpop.xlane.xlu2 %123 }
 0x121   :  { %v164_v18 = vsel %vm163_vm12, %v162_v14, %v124_v15  ;;  %v128_v26 = vpop.xlane.xlu1 %127 }
 0x122   :  { %v166_v19 = vsel %vm165_vm14, %v164_v18, %v137_v17  ;;  %v178_v30 = vsel %vm163_vm12, %v177_v28, %v128_v26 }
 0x123   :  { %v168_v20 = vsel %vm167_vm15, %v166_v19, %v150_v16 }
 0x124   :  { %v169_v21 = vmax.f32 %v168_v20, 1e-15 }
 0x126   :  { %v170_v22 = vmin.f32 %v169_v21, 1.0 }
 0x128   :  { %221 = vlog2.f32 %v170_v22  ;;  %v141_v27 = vpop.xlane.xlu2 %140 }
 0x129   :  { %v179_v32 = vsel %vm165_vm14, %v178_v30, %v141_v27 }
 0x12a   :  { %v180_v35 = vsel %vm167_vm15, %v179_v32, %v154_v33 }
 0x12e   :  { %v222_v29 = vpop.eup %221 }
 0x12f   :  { %v172_v31 = vmul.f32 0.6931472, %v222_v29 }
 0x131   :  { %v173_v34 = vsub.f32 0.0, %v172_v31 }
 0x133   :  { %v181_v36 = vmul.f32 %v180_v35, %v173_v34 }
 0x135   :  { %183 = vst.msk [vmem:[#allocation7] sm:$0x1] %vm182_vm0, %v181_v36 }
 0x136   :  { %194 = dma.vmem_to_hbm [thread:$0]  %s190_s3, 16, %s192_s29, [#allocation4]  }
 0x137   :  { %299 = dma.done.wait [#allocation4], 16  }
 0x138   :  { %300 = vsyncadd [#allocation4], 4294967280 }
 0x139   :  { %199 = vsyncpa [#allocation3], 1 }
 0x13a   :  { %200 = vsyncpa [#allocation6], 1 }
 0x13b   :  { %201 = vsyncpa [#allocation4], 1 }

</bundles_post_ra>
